<compile_context>
chip_gen: v7x
topology: tpu7x:2x2x1
jax: 0.10.0
libtpu: 0.0.40
codegen_flags: <defaults>
</compile_context>

<pallas_src>
import math
import numpy as np
import jax
import jax.numpy as jnp
from jax.experimental import pallas as pl
from jax.experimental.pallas import tpu as pltpu

B, S, D = 2, 8, 32          # batch, seq, input_dim
H = 4                        # num_heads
DK = D // H                  # d_k
F = 64                       # dim_feedforward
EPS = 1e-5                   # nn.LayerNorm default eps


# ----------------------------- fused encoder kernel -----------------------------
def encoder_layer_kernel(x_ref, vec_ref, mat_ref, out_ref):
    x = x_ref[...]                                                        # (16, 32)

    # ---- packed q/k/v projection (1/sqrt(d_k) folded into the q part at pack time) ----
    wqkv = mat_ref[0:32, 0:96]                                            # (32, 96)
    b_qkv = vec_ref[0:1, 0:96]                                            # (1, 96)
    qkv = jnp.dot(x, wqkv, preferred_element_type=jnp.float32) + b_qkv    # (16, 96)
    q = qkv[:, 0:32]
    k = qkv[:, 32:64]
    v = qkv[:, 64:96]

    # ---- batched masked attention over all B*S rows at once ----
    scores = jax.lax.dot_general(q, k, (((1,), (1,)), ((), ())),
                                 preferred_element_type=jnp.float32)      # (16, 16)
    scores = scores + mat_ref[0:16, 112:128]                              # block-diag 0 / -1e9
    m = jnp.max(scores, axis=-1, keepdims=True)
    e = jnp.exp(scores - m)                                               # masked entries -> 0
    attn = e * pl.reciprocal(jnp.sum(e, axis=-1, keepdims=True))          # exact reciprocal

    # Row-reorder attn to (j, b, p) order with a constant permutation matmul, then ctx.
    sel = mat_ref[0:16, 96:112]                                           # (16, 16) constant
    attn_p = jnp.dot(sel, attn, preferred_element_type=jnp.float32)       # rows = (j, b, p)
    ctx_p = jnp.dot(attn_p, v, preferred_element_type=jnp.float32)        # (16, 32)

    # ---- head shuffle + out-projection, all via MXU ----
    # Widen: ctx_wide[g, 32*j + d] = ctx[8b + 4p + j, d], g = 2b + p.
    ctx_wide = jnp.concatenate(
        [ctx_p[0:4, :], ctx_p[4:8, :], ctx_p[8:12, :], ctx_p[12:16, :]], axis=1)   # (4, 128)
    bigw = mat_ref[128:256, :]                                            # (128, 128) constant
    y = jnp.dot(ctx_wide, bigw, preferred_element_type=jnp.float32)       # (4, 128): [g, 32h+o]
    # Un-widen: stack lane blocks as rows (h, b, p), then permute rows back to token order.
    ystack = jnp.concatenate(
        [y[:, 0:32], y[:, 32:64], y[:, 64:96], y[:, 96:128]], axis=0)     # (16, 32)
    pmat = mat_ref[16:32, 96:112]                                         # (16, 16) constant
    attn_out = jnp.dot(pmat, ystack, preferred_element_type=jnp.float32) + vec_ref[2:3, 0:32]

    # ---- residual + LayerNorm 1 (single-pass variance) ----
    h1 = x + attn_out                                                     # dropout = identity
    mu = jnp.mean(h1, axis=-1, keepdims=True)
    ms = jnp.mean(h1 * h1, axis=-1, keepdims=True)
    h1 = (h1 - mu) * jax.lax.rsqrt(ms - mu * mu + EPS) * vec_ref[3:4, 0:32] + vec_ref[4:5, 0:32]

    # ---- FeedForward + residual + LayerNorm 2 ----
    w1 = mat_ref[32:64, 0:64]                                             # (32, 64)
    w2 = mat_ref[64:128, 0:32]                                            # (64, 32)
    ff = jnp.maximum(
        jnp.dot(h1, w1, preferred_element_type=jnp.float32) + vec_ref[1:2, 0:64], 0.0)
    ff = jnp.dot(ff, w2, preferred_element_type=jnp.float32) + vec_ref[5:6, 0:32]
    h2 = h1 + ff                                                          # dropout = identity
    mu2 = jnp.mean(h2, axis=-1, keepdims=True)
    ms2 = jnp.mean(h2 * h2, axis=-1, keepdims=True)
    out_ref[...] = ((h2 - mu2) * jax.lax.rsqrt(ms2 - mu2 * mu2 + EPS)
                    * vec_ref[6:7, 0:32] + vec_ref[7:8, 0:32])


@jax.jit
def encoder_layer(src, vecs, mats):
    """src: (B, S, D); vecs/mats: packed lane-dense parameter slabs."""
    x2d = src.reshape(B * S, D)                  # free, row-major contiguous
    vmem = pl.BlockSpec(memory_space=pltpu.MemorySpace.VMEM)
    out2d = pl.pallas_call(
        encoder_layer_kernel,
        out_shape=jax.ShapeDtypeStruct((B * S, D), jnp.float32),
        in_specs=[vmem, vmem, vmem],
        out_specs=vmem,
    )(x2d, vecs, mats)
    return out2d.reshape(B, S, D)


# ------------------------------- pure-JAX reference ------------------------------
def encoder_layer_ref(src, p):
    q = src @ p["wq_t"] + p["bq"]
    k = src @ p["wk_t"] + p["bk"]
    v = src @ p["wv_t"] + p["bv"]
    scores = jnp.einsum("bqd,bkd->bqk", q, k) / math.sqrt(DK)
    attn = jax.nn.softmax(scores, axis=-1)
    ctx = attn @ v
    perm = ctx.reshape(B, S, H, DK).transpose(0, 2, 1, 3).reshape(B, S, D)
    attn_out = perm @ p["wo_t"] + p["bo"]
    h = src + attn_out
    mu = h.mean(-1, keepdims=True)
    var = ((h - mu) ** 2).mean(-1, keepdims=True)
    h = (h - mu) / jnp.sqrt(var + EPS) * p["g1"] + p["be1"]
    ff = jnp.maximum(h @ p["w1_t"] + p["b1"], 0.0) @ p["w2_t"] + p["b2"]
    h2 = h + ff
    mu2 = h2.mean(-1, keepdims=True)
    var2 = ((h2 - mu2) ** 2).mean(-1, keepdims=True)
    return (h2 - mu2) / jnp.sqrt(var2 + EPS) * p["g2"] + p["be2"]


# ----------------------------------- params --------------------------------------
def init_params(key):
    """Deterministic init mimicking PyTorch defaults (Linear: U(-1/sqrt(fan_in), ...))."""
    def linear(k, fan_in, fan_out):
        k1, k2 = jax.random.split(k)
        bound = 1.0 / math.sqrt(fan_in)
        w = jax.random.uniform(k1, (fan_out, fan_in), jnp.float32, -bound, bound)
        b = jax.random.uniform(k2, (fan_out,), jnp.float32, -bound, bound)
        return w.T, b.reshape(1, fan_out)   # pre-transpose: (in, out)

    ks = jax.random.split(key, 6)
    p = {}
    p["wq_t"], p["bq"] = linear(ks[0], D, D)
    p["wk_t"], p["bk"] = linear(ks[1], D, D)
    p["wv_t"], p["bv"] = linear(ks[2], D, D)
    p["wo_t"], p["bo"] = linear(ks[3], D, D)
    p["w1_t"], p["b1"] = linear(ks[4], D, F)
    p["w2_t"], p["b2"] = linear(ks[5], F, D)
    p["g1"] = jnp.ones((1, D), jnp.float32)
    p["be1"] = jnp.zeros((1, D), jnp.float32)
    p["g2"] = jnp.ones((1, D), jnp.float32)
    p["be2"] = jnp.zeros((1, D), jnp.float32)
    return p


def pack_params(p):
    """One-time host-side packing into two lane-dense slabs (all shuffles pre-baked)."""
    inv = 1.0 / math.sqrt(DK)
    wqkv = np.concatenate([np.asarray(p["wq_t"]) * inv, np.asarray(p["wk_t"]),
                           np.asarray(p["wv_t"])], axis=1)                 # (32, 96)
    b_qkv = np.concatenate([np.asarray(p["bq"]) * inv, np.asarray(p["bk"]),
                            np.asarray(p["bv"])], axis=1)                  # (1, 96)

    # (8,128) per-feature vector slab.
    vecs = np.zeros((8, 128), np.float32)
    vecs[0, 0:96] = b_qkv[0]
    vecs[1, 0:64] = np.asarray(p["b1"])[0]
    vecs[2, 0:32] = np.asarray(p["bo"])[0]
    vecs[3, 0:32] = np.asarray(p["g1"])[0]
    vecs[4, 0:32] = np.asarray(p["be1"])[0]
    vecs[5, 0:32] = np.asarray(p["b2"])[0]
    vecs[6, 0:32] = np.asarray(p["g2"])[0]
    vecs[7, 0:32] = np.asarray(p["be2"])[0]

    # Constant permutation matrices (exact 0/1, applied on the MXU in-kernel).
    sel = np.zeros((16, 16), np.float32)    # ctx rows (b,p,j) -> (j,b,p)
    pmat = np.zeros((16, 16), np.float32)   # ystack rows (h,b,p) -> tokens (b, 2h+p)
    for b in range(B):
        for pp in range(2):
            for j in range(4):
                sel[4 * j + 2 * b + pp, 8 * b + 4 * pp + j] = 1.0
        for h in range(H):
            for pp in range(2):
                pmat[8 * b + 2 * h + pp, 4 * h + 2 * b + pp] = 1.0

    # Block-diagonal mask bias: 0 within a batch, -1e9 across batches.
    maskb = np.full((16, 16), -1e9, np.float32)
    for b in range(B):
        maskb[8 * b:8 * b + 8, 8 * b:8 * b + 8] = 0.0

    # BigW: head-shuffle folded into the out-projection.
    # BigW[32*j + d, 32*h + o] = [d//8 == h] * wo_t[8*j + d%8, o]
    wo = np.asarray(p["wo_t"])                                             # (32, 32)
    bigw = np.zeros((128, 128), np.float32)
    for j in range(4):
        for d in range(D):
            h = d // DK
            bigw[32 * j + d, 32 * h:32 * h + 32] = wo[DK * j + d % DK, :]

    # (256,128) weight slab.
    mats = np.zeros((256, 128), np.float32)
    mats[0:32, 0:96] = wqkv
    mats[0:16, 96:112] = sel
    mats[16:32, 96:112] = pmat
    mats[0:16, 112:128] = maskb
    mats[32:64, 0:64] = np.asarray(p["w1_t"])
    mats[64:128, 0:32] = np.asarray(p["w2_t"])
    mats[128:256, 0:128] = bigw
    return jnp.asarray(vecs), jnp.asarray(mats)


if __name__ == "__main__":
    key = jax.random.PRNGKey(0)
    k_x, k_p = jax.random.split(key)
    src = jax.random.normal(k_x, (B, S, D), jnp.float32)
    params = init_params(k_p)
    vecs, mats = pack_params(params)

    out = jax.block_until_ready(encoder_layer(src, vecs, mats))
    ref = jax.block_until_ready(encoder_layer_ref(src, params))
    assert out.shape == (B, S, D)
    assert jnp.allclose(out, ref, rtol=1e-4, atol=1e-4)
    print("KERNEL_OK")
</pallas_src>

<mosaic_0001>
module attributes {stable_mosaic.version = 11 : i64} {
  func.func @encoder_layer_kernel(%arg0: memref<16x32xf32, #tpu.memory_space<vmem>>, %arg1: memref<8x128xf32, #tpu.memory_space<vmem>>, %arg2: memref<256x128xf32, #tpu.memory_space<vmem>>, %arg3: memref<16x32xf32, #tpu.memory_space<vmem>>) attributes {dimension_semantics = [], scalar_prefetch = 0 : i64, scratch_operands = 0 : i64, tpu.core_type = #tpu.core_type<tc>} {
    %c0 = arith.constant 0 : index
    %c0_0 = arith.constant 0 : index
    %0 = vector.load %arg0[%c0, %c0_0] : memref<16x32xf32, #tpu.memory_space<vmem>>, vector<16x32xf32>
    %c0_1 = arith.constant 0 : index
    %c0_2 = arith.constant 0 : index
    %1 = vector.load %arg2[%c0_1, %c0_2] : memref<256x128xf32, #tpu.memory_space<vmem>>, vector<32x96xf32>
    %c0_3 = arith.constant 0 : index
    %c0_4 = arith.constant 0 : index
    %2 = vector.load %arg1[%c0_3, %c0_4] : memref<8x128xf32, #tpu.memory_space<vmem>>, vector<1x96xf32>
    %cst = arith.constant dense<0.000000e+00> : vector<16x96xf32>
    %3 = tpu.matmul %0, %1, %cst {dimension_numbers = #tpu.dot_dimension_numbers<[1], [0], [0], [1], [0, 0, 1, 1], [], []>} : vector<16x32xf32>, vector<32x96xf32>, vector<16x96xf32> -> vector<16x96xf32>
    %4 = vector.broadcast %2 : vector<1x96xf32> to vector<16x96xf32>
    %5 = arith.addf %3, %4 : vector<16x96xf32>
    %6 = vector.extract_strided_slice %5 {offsets = [0, 0], sizes = [16, 32], strides = [1, 1]} : vector<16x96xf32> to vector<16x32xf32>
    %7 = vector.extract_strided_slice %5 {offsets = [0, 32], sizes = [16, 32], strides = [1, 1]} : vector<16x96xf32> to vector<16x32xf32>
    %8 = vector.extract_strided_slice %5 {offsets = [0, 64], sizes = [16, 32], strides = [1, 1]} : vector<16x96xf32> to vector<16x32xf32>
    %cst_5 = arith.constant dense<0.000000e+00> : vector<16x16xf32>
    %9 = tpu.matmul %6, %7, %cst_5 {dimension_numbers = #tpu.dot_dimension_numbers<[1], [1], [0], [0], [0, 0, 1, 0], [], []>} : vector<16x32xf32>, vector<16x32xf32>, vector<16x16xf32> -> vector<16x16xf32>
    %c0_6 = arith.constant 0 : index
    %c112 = arith.constant 112 : index
    %10 = vector.load %arg2[%c0_6, %c112] : memref<256x128xf32, #tpu.memory_space<vmem>>, vector<16x16xf32>
    %11 = arith.addf %9, %10 : vector<16x16xf32>
    %cst_7 = arith.constant dense<0xFF800000> : vector<16xf32>
    %12 = vector.multi_reduction <maximumf>, %11, %cst_7 [1] : vector<16x16xf32> to vector<16xf32>
    %13 = vector.shape_cast %12 : vector<16xf32> to vector<16x1xf32>
    %14 = vector.broadcast %13 : vector<16x1xf32> to vector<16x16xf32>
    %15 = arith.subf %11, %14 : vector<16x16xf32>
    %16 = math.exp %15 : vector<16x16xf32>
    %cst_8 = arith.constant dense<0.000000e+00> : vector<16xf32>
    %17 = vector.multi_reduction <add>, %16, %cst_8 [1] : vector<16x16xf32> to vector<16xf32>
    %18 = vector.shape_cast %17 : vector<16xf32> to vector<16x1xf32>
    %19 = tpu.reciprocal %18 : vector<16x1xf32> -> vector<16x1xf32>
    %20 = vector.broadcast %19 : vector<16x1xf32> to vector<16x16xf32>
    %21 = arith.mulf %16, %20 : vector<16x16xf32>
    %c0_9 = arith.constant 0 : index
    %c96 = arith.constant 96 : index
    %22 = vector.load %arg2[%c0_9, %c96] : memref<256x128xf32, #tpu.memory_space<vmem>>, vector<16x16xf32>
    %cst_10 = arith.constant dense<0.000000e+00> : vector<16x16xf32>
    %23 = tpu.matmul %22, %21, %cst_10 {dimension_numbers = #tpu.dot_dimension_numbers<[1], [0], [0], [1], [0, 0, 1, 1], [], []>} : vector<16x16xf32>, vector<16x16xf32>, vector<16x16xf32> -> vector<16x16xf32>
    %cst_11 = arith.constant dense<0.000000e+00> : vector<16x32xf32>
    %24 = tpu.matmul %23, %8, %cst_11 {dimension_numbers = #tpu.dot_dimension_numbers<[1], [0], [0], [1], [0, 0, 1, 1], [], []>} : vector<16x16xf32>, vector<16x32xf32>, vector<16x32xf32> -> vector<16x32xf32>
    %25 = vector.extract_strided_slice %24 {offsets = [0, 0], sizes = [4, 32], strides = [1, 1]} : vector<16x32xf32> to vector<4x32xf32>
    %26 = vector.extract_strided_slice %24 {offsets = [4, 0], sizes = [4, 32], strides = [1, 1]} : vector<16x32xf32> to vector<4x32xf32>
    %27 = vector.extract_strided_slice %24 {offsets = [8, 0], sizes = [4, 32], strides = [1, 1]} : vector<16x32xf32> to vector<4x32xf32>
    %28 = vector.extract_strided_slice %24 {offsets = [12, 0], sizes = [4, 32], strides = [1, 1]} : vector<16x32xf32> to vector<4x32xf32>
    %29 = tpu.concatenate %25, %26, %27, %28 in 1 : vector<4x32xf32>, vector<4x32xf32>, vector<4x32xf32>, vector<4x32xf32> -> vector<4x128xf32>
    %c128 = arith.constant 128 : index
    %c0_12 = arith.constant 0 : index
    %30 = vector.load %arg2[%c128, %c0_12] : memref<256x128xf32, #tpu.memory_space<vmem>>, vector<128x128xf32>
    %cst_13 = arith.constant dense<0.000000e+00> : vector<4x128xf32>
    %31 = tpu.matmul %29, %30, %cst_13 {dimension_numbers = #tpu.dot_dimension_numbers<[1], [0], [0], [1], [0, 0, 1, 1], [], []>} : vector<4x128xf32>, vector<128x128xf32>, vector<4x128xf32> -> vector<4x128xf32>
    %32 = vector.extract_strided_slice %31 {offsets = [0, 0], sizes = [4, 32], strides = [1, 1]} : vector<4x128xf32> to vector<4x32xf32>
    %33 = vector.extract_strided_slice %31 {offsets = [0, 32], sizes = [4, 32], strides = [1, 1]} : vector<4x128xf32> to vector<4x32xf32>
    %34 = vector.extract_strided_slice %31 {offsets = [0, 64], sizes = [4, 32], strides = [1, 1]} : vector<4x128xf32> to vector<4x32xf32>
    %35 = vector.extract_strided_slice %31 {offsets = [0, 96], sizes = [4, 32], strides = [1, 1]} : vector<4x128xf32> to vector<4x32xf32>
    %36 = tpu.concatenate %32, %33, %34, %35 in 0 : vector<4x32xf32>, vector<4x32xf32>, vector<4x32xf32>, vector<4x32xf32> -> vector<16x32xf32>
    %c16 = arith.constant 16 : index
    %c96_14 = arith.constant 96 : index
    %37 = vector.load %arg2[%c16, %c96_14] : memref<256x128xf32, #tpu.memory_space<vmem>>, vector<16x16xf32>
    %cst_15 = arith.constant dense<0.000000e+00> : vector<16x32xf32>
    %38 = tpu.matmul %37, %36, %cst_15 {dimension_numbers = #tpu.dot_dimension_numbers<[1], [0], [0], [1], [0, 0, 1, 1], [], []>} : vector<16x16xf32>, vector<16x32xf32>, vector<16x32xf32> -> vector<16x32xf32>
    %c2 = arith.constant 2 : index
    %c0_16 = arith.constant 0 : index
    %39 = vector.load %arg1[%c2, %c0_16] : memref<8x128xf32, #tpu.memory_space<vmem>>, vector<1x32xf32>
    %40 = vector.broadcast %39 : vector<1x32xf32> to vector<16x32xf32>
    %41 = arith.addf %38, %40 : vector<16x32xf32>
    %42 = arith.addf %0, %41 : vector<16x32xf32>
    %cst_17 = arith.constant dense<0.000000e+00> : vector<16xf32>
    %43 = vector.multi_reduction <add>, %42, %cst_17 [1] : vector<16x32xf32> to vector<16xf32>
    %44 = vector.shape_cast %43 : vector<16xf32> to vector<16x1xf32>
    %cst_18 = arith.constant 3.200000e+01 : f32
    %45 = vector.broadcast %cst_18 : f32 to vector<16x1xf32>
    %46 = arith.divf %44, %45 : vector<16x1xf32>
    %47 = arith.mulf %42, %42 : vector<16x32xf32>
    %cst_19 = arith.constant dense<0.000000e+00> : vector<16xf32>
    %48 = vector.multi_reduction <add>, %47, %cst_19 [1] : vector<16x32xf32> to vector<16xf32>
    %49 = vector.shape_cast %48 : vector<16xf32> to vector<16x1xf32>
    %cst_20 = arith.constant 3.200000e+01 : f32
    %50 = vector.broadcast %cst_20 : f32 to vector<16x1xf32>
    %51 = arith.divf %49, %50 : vector<16x1xf32>
    %52 = vector.broadcast %46 : vector<16x1xf32> to vector<16x32xf32>
    %53 = arith.subf %42, %52 : vector<16x32xf32>
    %54 = arith.mulf %46, %46 : vector<16x1xf32>
    %55 = arith.subf %51, %54 : vector<16x1xf32>
    %cst_21 = arith.constant 9.99999974E-6 : f32
    %56 = vector.broadcast %cst_21 : f32 to vector<16x1xf32>
    %57 = arith.addf %55, %56 : vector<16x1xf32>
    %58 = math.rsqrt %57 : vector<16x1xf32>
    %59 = vector.broadcast %58 : vector<16x1xf32> to vector<16x32xf32>
    %60 = arith.mulf %53, %59 : vector<16x32xf32>
    %c3 = arith.constant 3 : index
    %c0_22 = arith.constant 0 : index
    %61 = vector.load %arg1[%c3, %c0_22] : memref<8x128xf32, #tpu.memory_space<vmem>>, vector<1x32xf32>
    %62 = vector.broadcast %61 : vector<1x32xf32> to vector<16x32xf32>
    %63 = arith.mulf %60, %62 : vector<16x32xf32>
    %c4 = arith.constant 4 : index
    %c0_23 = arith.constant 0 : index
    %64 = vector.load %arg1[%c4, %c0_23] : memref<8x128xf32, #tpu.memory_space<vmem>>, vector<1x32xf32>
    %65 = vector.broadcast %64 : vector<1x32xf32> to vector<16x32xf32>
    %66 = arith.addf %63, %65 : vector<16x32xf32>
    %c32 = arith.constant 32 : index
    %c0_24 = arith.constant 0 : index
    %67 = vector.load %arg2[%c32, %c0_24] : memref<256x128xf32, #tpu.memory_space<vmem>>, vector<32x64xf32>
    %c64 = arith.constant 64 : index
    %c0_25 = arith.constant 0 : index
    %68 = vector.load %arg2[%c64, %c0_25] : memref<256x128xf32, #tpu.memory_space<vmem>>, vector<64x32xf32>
    %cst_26 = arith.constant dense<0.000000e+00> : vector<16x64xf32>
    %69 = tpu.matmul %66, %67, %cst_26 {dimension_numbers = #tpu.dot_dimension_numbers<[1], [0], [0], [1], [0, 0, 1, 1], [], []>} : vector<16x32xf32>, vector<32x64xf32>, vector<16x64xf32> -> vector<16x64xf32>
    %c1 = arith.constant 1 : index
    %c0_27 = arith.constant 0 : index
    %70 = vector.load %arg1[%c1, %c0_27] : memref<8x128xf32, #tpu.memory_space<vmem>>, vector<1x64xf32>
    %71 = vector.broadcast %70 : vector<1x64xf32> to vector<16x64xf32>
    %72 = arith.addf %69, %71 : vector<16x64xf32>
    %cst_28 = arith.constant 0.000000e+00 : f32
    %73 = vector.broadcast %cst_28 : f32 to vector<16x64xf32>
    %74 = arith.maximumf %72, %73 : vector<16x64xf32>
    %cst_29 = arith.constant dense<0.000000e+00> : vector<16x32xf32>
    %75 = tpu.matmul %74, %68, %cst_29 {dimension_numbers = #tpu.dot_dimension_numbers<[1], [0], [0], [1], [0, 0, 1, 1], [], []>} : vector<16x64xf32>, vector<64x32xf32>, vector<16x32xf32> -> vector<16x32xf32>
    %c5 = arith.constant 5 : index
    %c0_30 = arith.constant 0 : index
    %76 = vector.load %arg1[%c5, %c0_30] : memref<8x128xf32, #tpu.memory_space<vmem>>, vector<1x32xf32>
    %77 = vector.broadcast %76 : vector<1x32xf32> to vector<16x32xf32>
    %78 = arith.addf %75, %77 : vector<16x32xf32>
    %79 = arith.addf %66, %78 : vector<16x32xf32>
    %cst_31 = arith.constant dense<0.000000e+00> : vector<16xf32>
    %80 = vector.multi_reduction <add>, %79, %cst_31 [1] : vector<16x32xf32> to vector<16xf32>
    %81 = vector.shape_cast %80 : vector<16xf32> to vector<16x1xf32>
    %cst_32 = arith.constant 3.200000e+01 : f32
    %82 = vector.broadcast %cst_32 : f32 to vector<16x1xf32>
    %83 = arith.divf %81, %82 : vector<16x1xf32>
    %84 = arith.mulf %79, %79 : vector<16x32xf32>
    %cst_33 = arith.constant dense<0.000000e+00> : vector<16xf32>
    %85 = vector.multi_reduction <add>, %84, %cst_33 [1] : vector<16x32xf32> to vector<16xf32>
    %86 = vector.shape_cast %85 : vector<16xf32> to vector<16x1xf32>
    %cst_34 = arith.constant 3.200000e+01 : f32
    %87 = vector.broadcast %cst_34 : f32 to vector<16x1xf32>
    %88 = arith.divf %86, %87 : vector<16x1xf32>
    %89 = vector.broadcast %83 : vector<16x1xf32> to vector<16x32xf32>
    %90 = arith.subf %79, %89 : vector<16x32xf32>
    %91 = arith.mulf %83, %83 : vector<16x1xf32>
    %92 = arith.subf %88, %91 : vector<16x1xf32>
    %cst_35 = arith.constant 9.99999974E-6 : f32
    %93 = vector.broadcast %cst_35 : f32 to vector<16x1xf32>
    %94 = arith.addf %92, %93 : vector<16x1xf32>
    %95 = math.rsqrt %94 : vector<16x1xf32>
    %96 = vector.broadcast %95 : vector<16x1xf32> to vector<16x32xf32>
    %97 = arith.mulf %90, %96 : vector<16x32xf32>
    %c6 = arith.constant 6 : index
    %c0_36 = arith.constant 0 : index
    %98 = vector.load %arg1[%c6, %c0_36] : memref<8x128xf32, #tpu.memory_space<vmem>>, vector<1x32xf32>
    %99 = vector.broadcast %98 : vector<1x32xf32> to vector<16x32xf32>
    %100 = arith.mulf %97, %99 : vector<16x32xf32>
    %c7 = arith.constant 7 : index
    %c0_37 = arith.constant 0 : index
    %101 = vector.load %arg1[%c7, %c0_37] : memref<8x128xf32, #tpu.memory_space<vmem>>, vector<1x32xf32>
    %102 = vector.broadcast %101 : vector<1x32xf32> to vector<16x32xf32>
    %103 = arith.addf %100, %102 : vector<16x32xf32>
    %c0_38 = arith.constant 0 : index
    %c0_39 = arith.constant 0 : index
    %104 = vector.load %arg3[%c0_38, %c0_39] : memref<16x32xf32, #tpu.memory_space<vmem>>, vector<16x32xf32>
    tpu.vector_store %arg3[%c0_38, %c0_39], %103 {strides = array<i32>} : memref<16x32xf32, #tpu.memory_space<vmem>>, vector<16x32xf32>,
    return
  }
}

</mosaic_0001>

<bundles_post_ra>
// kernel: encoder_layer.1
= control target key start
LH: loop header
LB: loop body
LE: loop exit
PB: predicated region body
PF: predicated region fallthrough
CT: control target
= control target key end

     0   :  { %8 = vsyncpa [#allocation3], 0  ;;  %s1493_s0 = inlined_call_operand.hbm [shape: f32[16,32], index: 0, kind: input, shape index: {}]   ;;  %s1494_s1 = inlined_call_operand.hbm [shape: f32[8,128], index: 1, kind: input, shape index: {}]   ;;  %s1495_s2 = inlined_call_operand.hbm [shape: f32[256,128], index: 2, kind: input, shape index: {}]   ;;  %s1496_s3 = inlined_call_operand.hbm [shape: f32[16,32], index: 3, kind: output, shape index: {}]  }
   0x1   :  { %9 = vsyncpa [#allocation6], 0 }
   0x2   :  { %10 = vsyncpa [#allocation4], 0  ;;  %s1336_s12 = smov [#allocation5]   ;;  %s1337_s14 = smov [#allocation2]  }
   0x3   :  { %s29_s13 = sshll.u32 %s1336_s12, 4  ;;  %s16_s15 = sshll.u32 %s1337_s14, 4  ;;  %s30_s13 = int_to_ptr.vmem [resolvable:$true] %s29_s13  ;;  %s1369_s15 = int_to_ptr.vmem [resolvable:$true] %s16_s15 }
   0x4   :  { %s1242_s18 = scalar_lea.hbm %s1494_s1, 128 }
   0x5   :  { %p1243_p0 = scmp.ne.s32.totalorder %s1494_s1, %s1242_s18  ;;  %p1246_p1 = scmp.lt.u32.totalorder %s1242_s18, %s1494_s1 }
   0x7   :  { %p1248_p2 = pnand %p1246_p1, %p1243_p0 }
   0x9   :  { %1251 = shalt.err (!%p1248_p2)
}
   0xa   :  { %s1252_s23 = scalar_lea.vmem %s30_s13, 128  ;;  %p1257_p4 = scmp.lt.s32.totalorder %s30_s13, %s30_s13 }
   0xb   :  { %p1253_p3 = scmp.ne.s32.totalorder %s30_s13, %s1252_s23  ;;  %p1258_p5 = scmp.lt.s32.totalorder %s1252_s23, %s1252_s23 }
   0xd   :  { %p1259_p6 = por %p1258_p5, %p1257_p4 }
   0xf   :  { %p1260_p7 = pnand %p1259_p6, %p1253_p3 }
  0x11   :  { %1263 = shalt.err (!%p1260_p7)
}
  0x12   :  { %32 = dma.hbm_to_vmem [thread:$0]  %s1494_s1, 128, %s30_s13, [#allocation6]  }
  0x13   :  { %s1264_s28 = scalar_lea.hbm %s1493_s0, 256 }
  0x14   :  { %p1265_p8 = scmp.ne.s32.totalorder %s1493_s0, %s1264_s28  ;;  %p1268_p9 = scmp.lt.u32.totalorder %s1264_s28, %s1493_s0 }
  0x16   :  { %p1270_p10 = pnand %p1268_p9, %p1265_p8 }
  0x18   :  { %1273 = shalt.err (!%p1270_p10)
}
  0x19   :  { %s1274_s6 = scalar_lea.vmem %s1369_s15, 256  ;;  %p1279_p12 = scmp.lt.s32.totalorder %s1369_s15, %s1369_s15 }
  0x1a   :  { %p1275_p11 = scmp.ne.s32.totalorder %s1369_s15, %s1274_s6  ;;  %p1280_p13 = scmp.lt.s32.totalorder %s1274_s6, %s1274_s6 }
  0x1c   :  { %p1281_p0 = por %p1280_p13, %p1279_p12 }
  0x1e   :  { %p1282_p1 = pnand %p1281_p0, %p1275_p11 }
  0x20   :  { %1285 = shalt.err (!%p1282_p1)
}
  0x21   :  { %s1338_s1 = smov 128   ;;  %s1339_s7 = smov 8  }
  0x22   :  { %22 = dma.hbm_to_vmem [thread:$0]  %s1493_s0, 256, %s1369_s15, [#allocation3], %s1338_s1, %s1338_s1, %s1339_s7  }
  0x23   :  { %s1340_s10 = smov [#allocation7]   ;;  %s1286_s14 = scalar_lea.hbm %s1495_s2, 4096 }
  0x24   :  { %s38_s11 = sshll.u32 %s1340_s10, 4  ;;  %p1287_p2 = scmp.ne.s32.totalorder %s1495_s2, %s1286_s14  ;;  %s39_s11 = int_to_ptr.vmem [resolvable:$true] %s38_s11 }
  0x25   :  { %p1290_p3 = scmp.lt.u32.totalorder %s1286_s14, %s1495_s2 }
  0x27   :  { %p1292_p4 = pnand %p1290_p3, %p1287_p2 }
  0x29   :  { %1295 = shalt.err (!%p1292_p4)
}
  0x2a   :  { %s1296_s20 = scalar_lea.vmem %s39_s11, 4096  ;;  %p1301_p6 = scmp.lt.s32.totalorder %s39_s11, %s39_s11 }
  0x2b   :  { %p1297_p5 = scmp.ne.s32.totalorder %s39_s11, %s1296_s20  ;;  %p1302_p7 = scmp.lt.s32.totalorder %s1296_s20, %s1296_s20 }
  0x2d   :  { %p1303_p8 = por %p1302_p7, %p1301_p6 }
  0x2f   :  { %p1304_p9 = pnand %p1303_p8, %p1297_p5 }
  0x31   :  { %1307 = shalt.err (!%p1304_p9)
}
  0x32   :  { %44 = dma.hbm_to_vmem [thread:$0]  %s1495_s2, 4096, %s39_s11, [#allocation6], %s1338_s1, %s1338_s1, %s1339_s7  }
  0x33   :  { %1330 = dma.done.wait [#allocation3], 256  }
  0x34   :  { %1331 = vsyncadd [#allocation3], 4294967040 }
  0x35   :  { %1332 = dma.done.wait [#allocation6], 4224  }
  0x36   :  { %1333 = vsyncadd [#allocation6], 4294963072  ;;  %vm65_vm0 = vcmask 261120   ;;  %v56_v0 = vld [vmem:[#allocation7] sm:$0xff]  ;;  %v57_v1 = vld [vmem:[#allocation7 + $0x8] sm:$0xff]  ;;  %s1341_s2 = smov 96  }
  0x37   :  { %v1418_v2 = vld [vmem:[#allocation7 + $0x10] sm:$0xff]  ;;  %v1129_v3 = vpack.c.bf16 %v57_v1, %v56_v0  ;;  %v1420_v4 = vld [vmem:[#allocation7 + $0x18] sm:$0xff]  ;;  %v1422_v5 = vld [vmem:[#allocation2] sm:$0xff]  ;;  %s1342_s21 = smov 16   ;;  %vm246_vm2 = vcmask 130048   ;;  %s1343_s22 = smov 32  }
  0x38   :  { %v1133_v6 = vpack.c.bf16 %v1420_v4, %v1418_v2  ;;  %1033 = vmatprep.mubr.msk.f32.mxu0 %vm65_vm0, %v1422_v5  ;;  %v1428_v7 = vld [vmem:[#allocation2 + $0x8] sm:$0xff]  ;;  %v946_v8 = vld [vmem:[#allocation5] ss:$0 sm:$0xff]  ;;  %159 = vrot.lane.b32.xlu1 %v57_v1, %s1342_s21  ;;  %vm1138_vm1 = vmpackc.low %vm65_vm0, %vm65_vm0  ;;  %s1344_s23 = smov 64   ;;  %v1345_v54 = vmov 0.0|0.0   ;;  %vm1346_vm3 = vmmov 0  }
  0x39   :  { %1130 = vmatprep.subr.bf16.mxu0 %v1129_v3  ;;  %v457_v51 = vld [vmem:[#allocation7 + $0x80] sm:$0xff]  ;;  %v458_v52 = vld [vmem:[#allocation7 + $0x88] sm:$0xff]  ;;  %v459_v53 = vld [vmem:[#allocation7 + $0x90] sm:$0xff]  ;;  %vm453_vm4 = vcmask 523264   ;;  %vm455_vm5 = vcmask 785408   ;;  %vm554_vm6 = vcmask 1043456  }
  0x3a   :  { %1132 = vmatpush3.bf16.msra.mxu0 %v1129_v3  ;;  %v1152_v55 = vpack.c.bf16 %v458_v52, %v457_v51  ;;  %v460_v56 = vld [vmem:[#allocation7 + $0x98] sm:$0xff]  ;;  %v461_v58 = vld [vmem:[#allocation7 + $0xa0] sm:$0xff]  ;;  %v462_v59 = vld [vmem:[#allocation7 + $0xa8] sm:$0xff]  ;;  %s1348_s24 = smov [#allocation8]  }
  0x3b   :  { %1134 = vmatprep.subr.bf16.mxu0 %v1133_v6  ;;  %v1155_v57 = vpack.c.bf16 %v460_v56, %v459_v53  ;;  %v1158_v60 = vpack.c.bf16 %v462_v59, %v461_v58  ;;  %v463_v61 = vld [vmem:[#allocation7 + $0xb0] sm:$0xff]  ;;  %v464_v62 = vld [vmem:[#allocation7 + $0xb8] sm:$0xff]  ;;  %v698_v53 = vld [vmem:[#allocation7 + $0x40] sm:$0xff]  ;;  %s933_s25 = sshll.u32 %s1348_s24, 4  ;;  %s934_s25 = int_to_ptr.vmem [resolvable:$true] %s933_s25 }
  0x3c   :  { %v1161_v63 = vpack.c.bf16 %v464_v62, %v463_v61  ;;  %v696_v51 = vld [vmem:[#allocation7 + $0x30] sm:$0xff]  ;;  %v697_v52 = vld [vmem:[#allocation7 + $0x38] sm:$0xff]  ;;  %s1308_s26 = scalar_lea.vmem %s934_s25, 256  ;;  %p1313_p11 = scmp.lt.s32.totalorder %s934_s25, %s934_s25 }
  0x3d   :  { %p1309_p10 = scmp.ne.s32.totalorder %s934_s25, %s1308_s26  ;;  %p1314_p12 = scmp.lt.s32.totalorder %s1308_s26, %s1308_s26 }
  0x3e   :  { %1136 = vmatpush3.bf16.msra.mxu0 %v1133_v6  ;;  %v467_v6 = vld [vmem:[#allocation7 + $0xd0] sm:$0xff] }
  0x3f   :  { %p1315_p13 = por %p1314_p12, %p1313_p11 }
  0x41   :  { %1034 = vmatmul.mubr.msk.f32.vlgmr.msra.gmra.mrb[0].mxu0 %vm65_vm0, %v1428_v7  ;;  %p1316_p0 = pnand %p1315_p13, %p1309_p10 }
  0xaa   :  { %v160_v18 = vpop.permute.xlu1 %159 }
 0x114   :  { %v1035_v9 = vpop.f32.mrb[0].mxu0 }
 0x115   :  { %v144_v10 = vadd.f32 %v1035_v9, %v946_v8  ;;  %v138_v11 = vpop.f32.mrb[1].mxu0 }
 0x116   :  { %v139_v12 = vadd.f32 %v946_v8, %v138_v11  ;;  %v468_v8 = vld [vmem:[#allocation7 + $0xd8] sm:$0xff]  ;;  %v470_v11 = vld [vmem:[#allocation7 + $0xe8] sm:$0xff] }
 0x117   :  { %v1167_v9 = vpack.c.bf16 %v468_v8, %v467_v6 }
 0x118   :  { %1040 = vmatprep.mubr.msk.f32.mxu1 %vm65_vm0, %v139_v12  ;;  %v1216_v13 = vpack.i.bf16 %v144_v10, %v139_v12 }
 0x11a   :  { %1217 = vrot.lane.b32.xlu0 %v1216_v13, %s1341_s2 }
 0x11e   :  { %157 = vrot.lane.b32.xlu0 %v56_v0, %s1342_s21 }
 0x18c   :  { %v1218_v14 = vpop.permute.xlu0 %1217 }
 0x18d   :  { %v1220_v15 = vunpack.i.h.bf16 %v1218_v14  ;;  %v1219_v16 = vunpack.i.l.bf16 %v1218_v14  ;;  %v472_v14 = vld [vmem:[#allocation7 + $0xf8] sm:$0xff] }
 0x18f   :  { %v1137_v17 = vpack.c.bf16 %v1220_v15, %v1219_v16  ;;  %v1347_v16 = vmov 0.0  }
 0x190   :  { %v158_v19 = vpop.permute.xlu0 %157 }
 0x191   :  { %1139 = vmatprep.subr.msk.bf16.mxu1 %vm1138_vm1, %v1137_v17 }
 0x192   :  { %1142 = vmatpush3.bf16.xpose.msk.msra.mxu1 %vm1138_vm1, %v1137_v17 }
 0x199   :  { %1041 = vmatmul.mubr.msk.f32.vlgmr.msra.gmra.mrb[0].mxu1 %vm65_vm0, %v144_v10  ;;  %v469_v10 = vld [vmem:[#allocation7 + $0xe0] sm:$0xff] }
 0x19a   :  { %v1170_v12 = vpack.c.bf16 %v470_v11, %v469_v10 }
 0x26c   :  { %v1042_v20 = vpop.f32.mrb[0].mxu1 }
 0x26d   :  { %v243_v21 = vadd.f32 %v1042_v20, %v160_v18  ;;  %v237_v22 = vpop.f32.mrb[1].mxu1 }
 0x26e   :  { %v238_v23 = vadd.f32 %v237_v22, %v158_v19 }
 0x26f   :  { %v250_v24 = vsel %vm246_vm2, %v243_v21, -inf }
 0x270   :  { %251 = vmax.xlane.f32.xlu0 %v250_v24  ;;  %v247_v25 = vsel %vm246_vm2, %v238_v23, -inf }
 0x271   :  { %248 = vmax.xlane.f32.xlu1 %v247_v25 }
 0x2fd   :  { %v252_v26 = vpop.xlane.xlu0 %251 }
 0x2fe   :  { %v254_v27 = vsub.f32 %v243_v21, %v252_v26  ;;  %v249_v28 = vpop.xlane.xlu1 %248 }
 0x2ff   :  { %v253_v29 = vsub.f32 %v238_v23, %v249_v28 }
 0x300   :  { %v257_v30 = vmul.f32 1.442695, %v254_v27 }
 0x301   :  { %v255_v31 = vmul.f32 1.442695, %v253_v29 }
 0x302   :  { %1226 = vpow2.f32 %v257_v30 }
 0x303   :  { %1228 = vpow2.f32 %v255_v31 }
 0x30c   :  { %v1227_v32 = vpop.eup %1226 }
 0x30d   :  { %v1229_v33 = vpop.eup %1228  ;;  %v262_v34 = vsel %vm246_vm2, %v1227_v32, 0.0 }
 0x30e   :  { %263 = vadd.xlane.f32.xlu1 %v262_v34  ;;  %v259_v35 = vsel %vm246_vm2, %v1229_v33, 0.0 }
 0x30f   :  { %260 = vadd.xlane.f32.xlu0 %v259_v35 }
 0x31f   :  { %271 = vrot.lane.b32.xlu1 %v57_v1, %s1343_s22  ;;  %v466_v1 = vld [vmem:[#allocation7 + $0xc8] sm:$0xff] }
 0x323   :  { %1222 = vrot.lane.b32.xlu1 %v1216_v13, %s1344_s23  ;;  %v471_v13 = vld [vmem:[#allocation7 + $0xf0] sm:$0xff] }
 0x324   :  { %v1173_v15 = vpack.c.bf16 %v472_v14, %v471_v13  ;;  %v961_v14 = vld [vmem:[#allocation5 + $0x4] ss:$0 sm:$0xff] }
 0x325   :  { %269 = vrot.lane.b32.xlu0 %v56_v0, %s1343_s22  ;;  %v465_v0 = vld [vmem:[#allocation7 + $0xc0] sm:$0xff] }
 0x326   :  { %v1164_v3 = vpack.c.bf16 %v466_v1, %v465_v0 }
 0x39b   :  { %v264_v36 = vpop.xlane.xlu1 %263 }
 0x39c   :  { %1230 = vrcp.f32 %v264_v36  ;;  %v261_v37 = vpop.xlane.xlu0 %260 }
 0x39d   :  { %1232 = vrcp.f32 %v261_v37 }
 0x39f   :  { %v272_v38 = vpop.permute.xlu1 %271 }
 0x3a0   :  { %v270_v39 = vpop.permute.xlu0 %269 }
 0x3a1   :  { %1047 = vmatprep.mubr.msk.f32.mxu0 %vm246_vm2, %v270_v39 }
 0x3a3   :  { %v1223_v40 = vpop.permute.xlu1 %1222 }
 0x3a4   :  { %v1225_v41 = vunpack.i.h.bf16 %v1223_v40  ;;  %v1224_v42 = vunpack.i.l.bf16 %v1223_v40 }
 0x3a6   :  { %v1231_v43 = vpop.eup %1230  ;;  %v1147_v44 = vpack.c.bf16 %v1225_v41, %v1224_v42 }
 0x3a7   :  { %v1233_v45 = vpop.eup %1232  ;;  %v268_v46 = vmul.f32 %v1231_v43, %v1227_v32 }
 0x3a8   :  { %1148 = vmatprep.subr.bf16.mxu1 %v1147_v44  ;;  %v267_v47 = vmul.f32 %v1233_v45, %v1229_v33 }
 0x3a9   :  { %1150 = vmatpush3.bf16.msra.mxu1 %v1147_v44 }
 0x3aa   :  { %v1143_v48 = vpack.c.bf16 %v268_v46, %v267_v47 }
 0x3ac   :  { %1144 = vmatprep.subr.bf16.mxu0 %v1143_v48 }
 0x3ad   :  { %1146 = vmatpush3.bf16.msra.mxu0 %v1143_v48 }
 0x3ae   :  { %1151 = vmatprep.subr.bf16.mxu0 %v1345_v54 }
 0x3b0   :  { %1048 = vmatmul.mubr.msk.f32.vlgmr.msra.gmra.mrb[2].mxu0 %vm246_vm2, %v272_v38 }
 0x3b1   :  { %1153 = vmatpush3.bf16.msra.mxu0 %v1152_v55  ;;  %1089 = vmatprep.mubr.msk.f32.mxu0 %vm1346_vm3, %v1347_v16 }
 0x3b2   :  { %1154 = vmatprep.subr.bf16.mxu0 %v1345_v54 }
 0x3b5   :  { %1156 = vmatpush3.bf16.msra.mxu0 %v1155_v57 }
 0x3b6   :  { %1157 = vmatprep.subr.bf16.mxu0 %v1345_v54 }
 0x3b9   :  { %1159 = vmatpush3.bf16.msra.mxu0 %v1158_v60 }
 0x3ba   :  { %1160 = vmatprep.subr.bf16.mxu0 %v1345_v54 }
 0x3bd   :  { %1162 = vmatpush3.bf16.msra.mxu0 %v1161_v63 }
 0x3be   :  { %1163 = vmatprep.subr.bf16.mxu0 %v1345_v54 }
 0x3c1   :  { %1165 = vmatpush3.bf16.msra.mxu0 %v1164_v3 }
 0x3c2   :  { %1166 = vmatprep.subr.bf16.mxu0 %v1345_v54 }
 0x3c5   :  { %1168 = vmatpush3.bf16.msra.mxu0 %v1167_v9 }
 0x3c6   :  { %1169 = vmatprep.subr.bf16.mxu0 %v1345_v54 }
 0x3c9   :  { %1171 = vmatpush3.bf16.msra.mxu0 %v1170_v12  ;;  %v960_v12 = vld [vmem:[#allocation5 + $0x3] ss:$0 sm:$0xff] }
 0x3ca   :  { %1172 = vmatprep.subr.bf16.mxu0 %v1345_v54  ;;  %v699_v54 = vld [vmem:[#allocation7 + $0x48] sm:$0xff] }
 0x3cb   :  { %v1187_v55 = vpack.c.bf16 %v699_v54, %v698_v53 }
 0x3cd   :  { %1174 = vmatpush3.bf16.msra.mxu0 %v1173_v15 }
 0x483   :  { %v1049_v49 = vpop.f32.mrb[2].mxu0 }
 0x484   :  { %v343_v50 = vpop.f32.mrb[3].mxu0 }
 0x485   :  { %1054 = vmatprep.mubr.msk.f32.mxu1 %vm246_vm2, %v343_v50  ;;  %v695_v50 = vld [vmem:[#allocation7 + $0x28] sm:$0xff] }
 0x486   :  { %1055 = vmatmul.mubr.msk.f32.vlgmr.msra.gmra.mrb[2].mxu1 %vm246_vm2, %v1049_v49  ;;  %v694_v49 = vld [vmem:[#allocation7 + $0x20] sm:$0xff] }
 0x559   :  { %v1056_v17 = vpop.f32.mrb[2].mxu1 }
 0x55a   :  { %445 = vrot.lane.b32.xlu1 %v1056_v17, %s1344_s23  ;;  %v430_v18 = vpop.f32.mrb[3].mxu1  ;;  %v448_v20 = vrot.slane %v1056_v17, 4 }
 0x55b   :  { %v440_v19 = vrot.slane %v430_v18, 4 }
 0x55d   :  { %441 = vrot.lane.b32.xlu0 %v440_v19, %s1343_s22 }
 0x561   :  { %449 = vrot.lane.b32.xlu0 %v448_v20, %s1341_s2  ;;  %v700_v20 = vld [vmem:[#allocation7 + $0x50] sm:$0xff] }
 0x5cc   :  { %v446_v23 = vpop.permute.xlu1 %445 }
 0x5cf   :  { %v442_v21 = vpop.permute.xlu0 %441 }
 0x5d0   :  { %v452_v22 = vsel %vm65_vm0, %v430_v18, %v442_v21  ;;  %v701_v21 = vld [vmem:[#allocation7 + $0x58] sm:$0xff] }
 0x5d1   :  { %v454_v24 = vsel %vm453_vm4, %v452_v22, %v446_v23 }
 0x5d3   :  { %v450_v25 = vpop.permute.xlu0 %449 }
 0x5d4   :  { %v456_v26 = vsel %vm455_vm5, %v454_v24, %v450_v25  ;;  %v1191_v24 = vpack.c.bf16 %v701_v21, %v700_v20  ;;  %v702_v25 = vld [vmem:[#allocation7 + $0x60] sm:$0xff] }
 0x5d5   :  { %1090 = vmatmul.mubr.f32.vlgmr.msra.gmra.mrb[4].mxu0 %v456_v26  ;;  %v703_v26 = vld [vmem:[#allocation7 + $0x68] sm:$0xff] }
 0x6a8   :  { %v539_v27 = vpop.f32.mrb[4].mxu0 }
 0x6a9   :  { %v544_v28 = vrot.slane %v539_v27, 4  ;;  %548 = vrot.lane.b32.xlu0 %v539_v27, %s1344_s23  ;;  %v1091_v29 = vpop.f32.mrb[5].mxu0 }
 0x6aa   :  { %v705_v29 = vld [vmem:[#allocation7 + $0x78] sm:$0xff] }
 0x6ab   :  { %545 = vrot.lane.b32.xlu1 %v544_v28, %s1341_s2 }
 0x6ad   :  { %564 = vrot.lane.b32.xlu0 %v1418_v2, %s1343_s22  ;;  %v957_v2 = vld [vmem:[#allocation5 + $0x2] ss:$0 sm:$0xff] }
 0x6af   :  { %551 = vrot.lane.b32.xlu1 %v544_v28, %s1343_s22  ;;  %v704_v28 = vld [vmem:[#allocation7 + $0x70] sm:$0xff] }
 0x6b3   :  { %566 = vrot.lane.b32.xlu1 %v1420_v4, %s1343_s22 }
 0x71b   :  { %v549_v30 = vpop.permute.xlu0 %548 }
 0x71d   :  { %v546_v31 = vpop.permute.xlu1 %545 }
 0x71e   :  { %v555_v34 = vsel %vm554_vm6, %v539_v27, %v546_v31  ;;  %v1195_v27 = vpack.c.bf16 %v703_v26, %v702_v25  ;;  %v962_v31 = vld [vmem:[#allocation5 + $0x1] ss:$0 sm:$0xff] }
 0x71f   :  { %v565_v32 = vpop.permute.xlu0 %564 }
 0x720   :  { %1096 = vmatprep.mubr.msk.f32.mxu1 %vm246_vm2, %v565_v32 }
 0x721   :  { %v552_v33 = vpop.permute.xlu1 %551 }
 0x722   :  { %v556_v35 = vsel %vm554_vm6, %v549_v30, %v552_v33  ;;  %v1199_v30 = vpack.c.bf16 %v705_v29, %v704_v28 }
 0x723   :  { %v1175_v36 = vpack.c.bf16 %v556_v35, %v555_v34 }
 0x725   :  { %1176 = vmatprep.subr.bf16.mxu1 %v1175_v36  ;;  %v567_v37 = vpop.permute.xlu1 %566 }
 0x726   :  { %1178 = vmatpush3.bf16.msra.mxu1 %v1175_v36 }
 0x729   :  { %1097 = vmatmul.mubr.msk.f32.vlgmr.msra.gmra.mrb[4].mxu1 %vm246_vm2, %v567_v37 }
 0x7fc   :  { %v1098_v38 = vpop.f32.mrb[4].mxu1 }
 0x7fd   :  { %v644_v39 = vadd.f32 %v1098_v38, %v957_v2  ;;  %v638_v40 = vpop.f32.mrb[5].mxu1 }
 0x7fe   :  { %v639_v4 = vadd.f32 %v957_v2, %v638_v40  ;;  %v965_v2 = vld [vmem:[#allocation5 + $0x5] ss:$0 sm:$0xff] }
 0x7ff   :  { %v648_v41 = vadd.f32 %v644_v39, %v1428_v7  ;;  %v1179_v7 = vpack.c.bf16 %v695_v50, %v694_v49 }
 0x800   :  { %v647_v42 = vadd.f32 %v639_v4, %v1422_v5  ;;  %v1183_v5 = vpack.c.bf16 %v697_v52, %v696_v51 }
 0x801   :  { %v652_v43 = vsel %vm65_vm0, %v648_v41, 0.0  ;;  %v659_v47 = vmul.f32 %v648_v41, %v648_v41  ;;  %1180 = vmatprep.subr.bf16.mxu1 %v1179_v7 }
 0x802   :  { %653 = vadd.xlane.f32.xlu1 %v652_v43  ;;  %v649_v44 = vsel %vm65_vm0, %v647_v42, 0.0  ;;  %v658_v45 = vmul.f32 %v647_v42, %v647_v42  ;;  %1182 = vmatpush3.bf16.msra.mxu1 %v1179_v7 }
 0x803   :  { %650 = vadd.xlane.f32.xlu0 %v649_v44  ;;  %v663_v48 = vsel %vm65_vm0, %v659_v47, 0.0  ;;  %1184 = vmatprep.subr.bf16.mxu1 %v1183_v5 }
 0x804   :  { %v660_v46 = vsel %vm65_vm0, %v658_v45, 0.0 }
 0x806   :  { %1186 = vmatpush3.bf16.msra.mxu1 %v1183_v5 }
 0x807   :  { %661 = vadd.xlane.f32.xlu0 %v660_v46  ;;  %1188 = vmatprep.subr.bf16.mxu1 %v1187_v55 }
 0x80b   :  { %664 = vadd.xlane.f32.xlu0 %v663_v48 }
 0x88f   :  { %v654_v58 = vpop.xlane.xlu1 %653 }
 0x890   :  { %v651_v56 = vpop.xlane.xlu0 %650  ;;  %v657_v60 = vmul.f32 0.03125, %v654_v58 }
 0x891   :  { %v656_v57 = vmul.f32 0.03125, %v651_v56 }
 0x892   :  { %v671_v1 = vmul.f32 %v657_v60, %v657_v60  ;;  %v669_v15 = vsub.f32 %v648_v41, %v657_v60 }
 0x893   :  { %v670_v61 = vmul.f32 %v656_v57, %v656_v57  ;;  %v668_v10 = vsub.f32 %v647_v42, %v656_v57 }
 0x894   :  { %v662_v59 = vpop.xlane.xlu0 %661 }
 0x895   :  { %v666_v62 = vmul.f32 0.03125, %v662_v59 }
 0x897   :  { %v672_v63 = vsub.f32 %v666_v62, %v670_v61 }
 0x898   :  { %v665_v0 = vpop.xlane.xlu0 %664 }
 0x899   :  { %v674_v3 = vadd.f32 1e-05, %v672_v63  ;;  %v667_v6 = vmul.f32 0.03125, %v665_v0  ;;  %v968_v0 = vld [vmem:[#allocation5 + $0x6] ss:$0 sm:$0xff] }
 0x89b   :  { %1234 = vrsqrt.f32 %v674_v3  ;;  %v673_v8 = vsub.f32 %v667_v6, %v671_v1 }
 0x89d   :  { %v675_v9 = vadd.f32 1e-05, %v673_v8  ;;  %v969_v8 = vld [vmem:[#allocation5 + $0x7] ss:$0 sm:$0xff] }
 0x89f   :  { %1236 = vrsqrt.f32 %v675_v9 }
 0x8a5   :  { %v1235_v11 = vpop.eup %1234 }
 0x8a6   :  { %v678_v13 = vmul.f32 %v1235_v11, %v668_v10 }
 0x8a8   :  { %v685_v16 = vmul.f32 %v960_v12, %v678_v13 }
 0x8a9   :  { %v1237_v17 = vpop.eup %1236 }
 0x8aa   :  { %v679_v18 = vmul.f32 %v1237_v17, %v669_v15  ;;  %v692_v19 = vadd.f32 %v961_v14, %v685_v16 }
 0x8ac   :  { %v686_v22 = vmul.f32 %v960_v12, %v679_v18  ;;  %1107 = vmatprep.mubr.msk.f32.mxu1 %vm65_vm0, %v692_v19 }
 0x8ae   :  { %v693_v23 = vadd.f32 %v961_v14, %v686_v22 }
 0x8b0   :  { %1108 = vmatmul.mubr.msk.f32.vlgmr.msra.gmra.mrb[6].mxu1 %vm65_vm0, %v693_v23 }
 0x8b1   :  { %1190 = vmatpush3.bf16.msra.mxu1 %v1187_v55 }
 0x8b2   :  { %1192 = vmatprep.subr.bf16.mxu1 %v1191_v24 }
 0x8b5   :  { %1194 = vmatpush3.bf16.msra.mxu1 %v1191_v24 }
 0x8b6   :  { %1196 = vmatprep.subr.bf16.mxu1 %v1195_v27 }
 0x8b9   :  { %1198 = vmatpush3.bf16.msra.mxu1 %v1195_v27 }
 0x8ba   :  { %1200 = vmatprep.subr.bf16.mxu1 %v1199_v30 }
 0x8bd   :  { %1202 = vmatpush3.bf16.msra.mxu1 %v1199_v30 }
 0x983   :  { %v1109_v32 = vpop.f32.mrb[6].mxu1 }
 0x984   :  { %v789_v33 = vadd.f32 %v1109_v32, %v962_v31  ;;  %v783_v34 = vpop.f32.mrb[7].mxu1 }
 0x985   :  { %v784_v35 = vadd.f32 %v962_v31, %v783_v34 }
 0x986   :  { %v793_v37 = vmax.f32 %v789_v33, 0.0 }
 0x987   :  { %v792_v36 = vmax.f32 %v784_v35, 0.0 }
 0x989   :  { %1126 = vmatprep.mubr.msk.f32.mxu1 %vm453_vm4, %v792_v36 }
 0x98a   :  { %1127 = vmatmul.mubr.msk.f32.vlgmr.msra.gmra.mrb[8].mxu1 %vm453_vm4, %v793_v37 }
 0xa5d   :  { %v1128_v38 = vpop.f32.mrb[8].mxu1 }
 0xa5e   :  { %v877_v39 = vadd.f32 %v1128_v38, %v965_v2  ;;  %v871_v40 = vpop.f32.mrb[9].mxu1 }
 0xa5f   :  { %v872_v4 = vadd.f32 %v965_v2, %v871_v40 }
 0xa60   :  { %v881_v41 = vadd.f32 %v877_v39, %v693_v23 }
 0xa61   :  { %v880_v42 = vadd.f32 %v872_v4, %v692_v19 }
 0xa62   :  { %v885_v43 = vsel %vm65_vm0, %v881_v41, 0.0  ;;  %v891_v44 = vmul.f32 %v881_v41, %v881_v41 }
 0xa63   :  { %886 = vadd.xlane.f32.xlu0 %v885_v43  ;;  %v882_v45 = vsel %vm65_vm0, %v880_v42, 0.0  ;;  %v890_v46 = vmul.f32 %v880_v42, %v880_v42 }
 0xa64   :  { %883 = vadd.xlane.f32.xlu1 %v882_v45  ;;  %v895_v47 = vsel %vm65_vm0, %v891_v44, 0.0 }
 0xa65   :  { %v892_v48 = vsel %vm65_vm0, %v890_v46, 0.0 }
 0xa67   :  { %896 = vadd.xlane.f32.xlu0 %v895_v47 }
 0xa68   :  { %893 = vadd.xlane.f32.xlu1 %v892_v48 }
 0xaf0   :  { %v887_v49 = vpop.xlane.xlu0 %886 }
 0xaf1   :  { %v889_v50 = vmul.f32 0.03125, %v887_v49  ;;  %v884_v51 = vpop.xlane.xlu1 %883 }
 0xaf2   :  { %v888_v7 = vmul.f32 0.03125, %v884_v51 }
 0xaf3   :  { %v903_v5 = vmul.f32 %v889_v50, %v889_v50  ;;  %v901_v61 = vsub.f32 %v881_v41, %v889_v50 }
 0xaf4   :  { %v897_v52 = vpop.xlane.xlu0 %896  ;;  %v902_v55 = vmul.f32 %v888_v7, %v888_v7  ;;  %v900_v63 = vsub.f32 %v880_v42, %v888_v7 }
 0xaf5   :  { %v899_v53 = vmul.f32 0.03125, %v897_v52  ;;  %v894_v54 = vpop.xlane.xlu1 %893 }
 0xaf6   :  { %v898_v56 = vmul.f32 0.03125, %v894_v54 }
 0xaf7   :  { %v905_v57 = vsub.f32 %v899_v53, %v903_v5 }
 0xaf8   :  { %v904_v58 = vsub.f32 %v898_v56, %v902_v55 }
 0xaf9   :  { %v907_v59 = vadd.f32 1e-05, %v905_v57 }
 0xafa   :  { %v906_v60 = vadd.f32 1e-05, %v904_v58 }
 0xafb   :  { %1238 = vrsqrt.f32 %v907_v59 }
 0xafc   :  { %1240 = vrsqrt.f32 %v906_v60 }
 0xb05   :  { %v1239_v62 = vpop.eup %1238 }
 0xb06   :  { %v1241_v1 = vpop.eup %1240  ;;  %v911_v3 = vmul.f32 %v1239_v62, %v901_v61 }
 0xb07   :  { %v910_v6 = vmul.f32 %v1241_v1, %v900_v63 }
 0xb08   :  { %v918_v9 = vmul.f32 %v968_v0, %v911_v3 }
 0xb09   :  { %v917_v10 = vmul.f32 %v968_v0, %v910_v6 }
 0xb0a   :  { %v925_v11 = vadd.f32 %v969_v8, %v918_v9 }
 0xb0b   :  { %v924_v12 = vadd.f32 %v969_v8, %v917_v10 }
 0xb0c   :  { %927 = vst.msk [vmem:[#allocation8 + $0x8] sm:$0xff] %vm65_vm0, %v925_v11 }
 0xb0d   :  { %926 = vst.msk [vmem:[#allocation8] sm:$0xff] %vm65_vm0, %v924_v12 }
 0xb0e   :  { %1319 = shalt.err (!%p1316_p0)
}
 0xb0f   :  { %s1320_s29 = scalar_lea.hbm %s1496_s3, 256 }
 0xb10   :  { %p1321_p1 = scmp.ne.s32.totalorder %s1496_s3, %s1320_s29  ;;  %p1324_p2 = scmp.lt.u32.totalorder %s1320_s29, %s1496_s3 }
 0xb12   :  { %p1326_p3 = pnand %p1324_p2, %p1321_p1 }
 0xb14   :  { %1329 = shalt.err (!%p1326_p3)
}
 0xb15   :  { %939 = dma.vmem_to_hbm [thread:$0]  %s934_s25, 256, %s1496_s3, [#allocation4], %s1338_s1, %s1338_s1, %s1339_s7  }
 0xb16   :  { %1334 = dma.done.wait [#allocation4], 256  }
 0xb17   :  { %1335 = vsyncadd [#allocation4], 4294967040 }
 0xb18   :  { %943 = vsyncpa [#allocation3], 1 }
 0xb19   :  { %944 = vsyncpa [#allocation6], 1 }
 0xb1a   :  { %945 = vsyncpa [#allocation4], 1 }

</bundles_post_ra>
